<compile_context>
chip_gen: v7x
topology: tpu7x:2x2x1
jax: 0.10.0
libtpu: 0.0.40
codegen_flags: <defaults>
</compile_context>

<pallas_src>
import jax
import jax.numpy as jnp
from jax import lax
from jax.experimental import pallas as pl
from jax.experimental.pallas import tpu as pltpu  # noqa: F401  (kept for TPU-specific extensions)


def attn_like_kernel(x_ref, w_ref, b_ref, v_ref, o_ref):
    B, S, D = v_ref.shape

    # One fused projection over the flattened batch:
    #   proj = [q_flat | k_flat] @ blockdiag(Wq^T, Wk_s^T) + [bq | bk_s]
    # -> proj[:, :D] = query projection, proj[:, D:] = (pre-scaled) key projection.
    proj = jnp.dot(x_ref[...], w_ref[...],
                   preferred_element_type=jnp.float32) + b_ref[...]   # (B*S, 2D)

    outs = []
    for b in range(B):  # B is tiny & static -> fully unrolled
        pb = proj[b * S:(b + 1) * S, :]                               # (S, 2D), sublane-aligned slice

        # Gram matrix of the fused projection block: g[i, j] = sum_s pb[s, i] * pb[s, j].
        # Its lower-left (D, D) block is exactly kp_b^T @ qp_b (the scaled scores),
        # obtained with only aligned slices (rows D: = sublane offset 16, cols :D = lane offset 0).
        g = lax.dot_general(pb, pb, (((0,), (0,)), ((), ())),
                            preferred_element_type=jnp.float32)       # (2D, 2D)
        m = g[D:, :D]                                                 # (D, D) pre-scaled scores

        # Numerically stable softmax along the last dim (exact reciprocal -> EUP path).
        m = m - jnp.max(m, axis=-1, keepdims=True)
        p = jnp.exp(m)
        p = p * pl.reciprocal(jnp.sum(p, axis=-1, keepdims=True), approx=False)

        # out_b = value_b @ softmax -> (S, D)
        outs.append(jnp.dot(v_ref[b], p, preferred_element_type=jnp.float32))

    # Single store of the whole result.
    o_ref[...] = jnp.concatenate(outs, axis=0).astype(o_ref.dtype)


def model_forward(query, key, value, wq, bq, wk, bk, inv_scale):
    B, S, D = query.shape
    scale = 1.0 / float(inv_scale)

    # PyTorch Linear weights are (out, in): kernel computes x @ W^T + b.
    # Fold 1/inv_scale into the key projection, then pack both projections into
    # one block-diagonal weight and one bias row.
    wq_t = wq.T                                                       # (D, D)
    wk_ts = wk.T * scale                                              # (D, D)
    zeros = jnp.zeros((D, D), dtype=jnp.float32)
    w_fused = jnp.concatenate(
        [jnp.concatenate([wq_t, zeros], axis=1),
         jnp.concatenate([zeros, wk_ts], axis=1)], axis=0)            # (2D, 2D)
    b_fused = jnp.concatenate([bq, bk * scale]).reshape(1, 2 * D)     # (1, 2D)

    # Column-concat the flattened inputs so both projections are one MXU push.
    x = jnp.concatenate([query.reshape(B * S, D), key.reshape(B * S, D)], axis=1)  # (B*S, 2D)

    cost = pl.CostEstimate(
        flops=(2 * (B * S) * (2 * D) * (2 * D)        # fused projection
               + B * 2 * S * (2 * D) * (2 * D)        # gram / score matmuls
               + B * 2 * S * D * D),                  # value @ softmax
        transcendentals=B * D * D,                    # exp
        bytes_accessed=4 * (B * S * 2 * D + 4 * D * D + 2 * D + 2 * B * S * D),
    )

    out_flat = pl.pallas_call(
        attn_like_kernel,
        out_shape=jax.ShapeDtypeStruct((B * S, D), jnp.float32),
        # No grid: one invocation, whole (tiny) operands resident in VMEM.
        in_specs=[
            pl.BlockSpec((B * S, 2 * D)),   # x = [q | k]
            pl.BlockSpec((2 * D, 2 * D)),   # blockdiag(Wq^T, Wk_s^T)
            pl.BlockSpec((1, 2 * D)),       # [bq | bk_s]
            pl.BlockSpec((B, S, D)),        # value
        ],
        out_specs=pl.BlockSpec((B * S, D)),
        cost_estimate=cost,
    )(x, w_fused, b_fused, value)

    return out_flat.reshape(B, S, D)


def ref_forward(query, key, value, wq, bq, wk, bk, inv_scale):
    kp = jnp.einsum('bsd,ed->bse', key, wk) + bk        # Linear_key(key)
    qp = jnp.einsum('bsd,ed->bse', query, wq) + bq      # Linear_query(query)
    m3 = jnp.einsum('bsd,bse->bde', kp, qp)             # kp^T @ qp per batch
    m4 = m3 / inv_scale
    p = jax.nn.softmax(m4, axis=-1)
    return jnp.einsum('bsd,bde->bse', value, p)


if __name__ == "__main__":
    B, S, D = 2, 8, 16
    inv_scale = 1.0

    root = jax.random.PRNGKey(0)
    kq, kk, kv, kwq, kbq, kwk, kbk = jax.random.split(root, 7)

    query = jax.random.normal(kq, (B, S, D), dtype=jnp.float32)
    key = jax.random.normal(kk, (B, S, D), dtype=jnp.float32)
    value = jax.random.normal(kv, (B, S, D), dtype=jnp.float32)

    # Deterministic "Linear(16, 16)" parameters (PyTorch layout: (out, in)).
    bound = 1.0 / jnp.sqrt(D)
    wq = jax.random.uniform(kwq, (D, D), minval=-bound, maxval=bound, dtype=jnp.float32)
    bq = jax.random.uniform(kbq, (D,), minval=-bound, maxval=bound, dtype=jnp.float32)
    wk = jax.random.uniform(kwk, (D, D), minval=-bound, maxval=bound, dtype=jnp.float32)
    bk = jax.random.uniform(kbk, (D,), minval=-bound, maxval=bound, dtype=jnp.float32)

    out = model_forward(query, key, value, wq, bq, wk, bk, inv_scale)
    out = jax.block_until_ready(out)

    ref = ref_forward(query, key, value, wq, bq, wk, bk, inv_scale)
    assert out.shape == (B, S, D)
    # Exact reciprocal restored; remaining slack only covers default-precision
    # MXU matmul rounding-order differences between kernel and reference.
    assert jnp.allclose(out, ref, atol=1e-3, rtol=1e-3), "mismatch vs reference"

    print("KERNEL_OK")
</pallas_src>

<mosaic_0001>
module attributes {stable_mosaic.version = 11 : i64} {
  func.func @attn_like_kernel(%arg0: memref<16x32xf32, #tpu.memory_space<vmem>>, %arg1: memref<32x32xf32, #tpu.memory_space<vmem>>, %arg2: memref<1x32xf32, #tpu.memory_space<vmem>>, %arg3: memref<2x8x16xf32, #tpu.memory_space<vmem>>, %arg4: memref<16x16xf32, #tpu.memory_space<vmem>>) attributes {dimension_semantics = [], scalar_prefetch = 0 : i64, scratch_operands = 0 : i64, tpu.core_type = #tpu.core_type<tc>} {
    %c0 = arith.constant 0 : index
    %c0_0 = arith.constant 0 : index
    %0 = vector.load %arg0[%c0, %c0_0] : memref<16x32xf32, #tpu.memory_space<vmem>>, vector<16x32xf32>
    %c0_1 = arith.constant 0 : index
    %c0_2 = arith.constant 0 : index
    %1 = vector.load %arg1[%c0_1, %c0_2] : memref<32x32xf32, #tpu.memory_space<vmem>>, vector<32x32xf32>
    %cst = arith.constant dense<0.000000e+00> : vector<16x32xf32>
    %2 = tpu.matmul %0, %1, %cst {dimension_numbers = #tpu.dot_dimension_numbers<[1], [0], [0], [1], [0, 0, 1, 1], [], []>} : vector<16x32xf32>, vector<32x32xf32>, vector<16x32xf32> -> vector<16x32xf32>
    %c0_3 = arith.constant 0 : index
    %c0_4 = arith.constant 0 : index
    %3 = vector.load %arg2[%c0_3, %c0_4] : memref<1x32xf32, #tpu.memory_space<vmem>>, vector<1x32xf32>
    %4 = vector.broadcast %3 : vector<1x32xf32> to vector<16x32xf32>
    %5 = arith.addf %2, %4 : vector<16x32xf32>
    %6 = vector.extract_strided_slice %5 {offsets = [0, 0], sizes = [8, 32], strides = [1, 1]} : vector<16x32xf32> to vector<8x32xf32>
    %cst_5 = arith.constant dense<0.000000e+00> : vector<32x32xf32>
    %7 = tpu.matmul %6, %6, %cst_5 {dimension_numbers = #tpu.dot_dimension_numbers<[0], [0], [1], [1], [0, 1, 1, 1], [], []>} : vector<8x32xf32>, vector<8x32xf32>, vector<32x32xf32> -> vector<32x32xf32>
    %8 = vector.extract_strided_slice %7 {offsets = [16, 0], sizes = [16, 16], strides = [1, 1]} : vector<32x32xf32> to vector<16x16xf32>
    %cst_6 = arith.constant dense<0xFF800000> : vector<16xf32>
    %9 = vector.multi_reduction <maximumf>, %8, %cst_6 [1] : vector<16x16xf32> to vector<16xf32>
    %10 = vector.shape_cast %9 : vector<16xf32> to vector<16x1xf32>
    %11 = vector.broadcast %10 : vector<16x1xf32> to vector<16x16xf32>
    %12 = arith.subf %8, %11 : vector<16x16xf32>
    %13 = math.exp %12 : vector<16x16xf32>
    %cst_7 = arith.constant dense<0.000000e+00> : vector<16xf32>
    %14 = vector.multi_reduction <add>, %13, %cst_7 [1] : vector<16x16xf32> to vector<16xf32>
    %15 = vector.shape_cast %14 : vector<16xf32> to vector<16x1xf32>
    %16 = tpu.reciprocal %15 : vector<16x1xf32> -> vector<16x1xf32>
    %17 = vector.broadcast %16 : vector<16x1xf32> to vector<16x16xf32>
    %18 = arith.mulf %13, %17 : vector<16x16xf32>
    %c0_8 = arith.constant 0 : index
    %c0_9 = arith.constant 0 : index
    %c0_10 = arith.constant 0 : index
    %19 = vector.load %arg3[%c0_8, %c0_9, %c0_10] : memref<2x8x16xf32, #tpu.memory_space<vmem>>, vector<1x8x16xf32>
    %20 = vector.shape_cast %19 : vector<1x8x16xf32> to vector<8x16xf32>
    %cst_11 = arith.constant dense<0.000000e+00> : vector<8x16xf32>
    %21 = tpu.matmul %20, %18, %cst_11 {dimension_numbers = #tpu.dot_dimension_numbers<[1], [0], [0], [1], [0, 0, 1, 1], [], []>} : vector<8x16xf32>, vector<16x16xf32>, vector<8x16xf32> -> vector<8x16xf32>
    %22 = vector.extract_strided_slice %5 {offsets = [8, 0], sizes = [8, 32], strides = [1, 1]} : vector<16x32xf32> to vector<8x32xf32>
    %cst_12 = arith.constant dense<0.000000e+00> : vector<32x32xf32>
    %23 = tpu.matmul %22, %22, %cst_12 {dimension_numbers = #tpu.dot_dimension_numbers<[0], [0], [1], [1], [0, 1, 1, 1], [], []>} : vector<8x32xf32>, vector<8x32xf32>, vector<32x32xf32> -> vector<32x32xf32>
    %24 = vector.extract_strided_slice %23 {offsets = [16, 0], sizes = [16, 16], strides = [1, 1]} : vector<32x32xf32> to vector<16x16xf32>
    %cst_13 = arith.constant dense<0xFF800000> : vector<16xf32>
    %25 = vector.multi_reduction <maximumf>, %24, %cst_13 [1] : vector<16x16xf32> to vector<16xf32>
    %26 = vector.shape_cast %25 : vector<16xf32> to vector<16x1xf32>
    %27 = vector.broadcast %26 : vector<16x1xf32> to vector<16x16xf32>
    %28 = arith.subf %24, %27 : vector<16x16xf32>
    %29 = math.exp %28 : vector<16x16xf32>
    %cst_14 = arith.constant dense<0.000000e+00> : vector<16xf32>
    %30 = vector.multi_reduction <add>, %29, %cst_14 [1] : vector<16x16xf32> to vector<16xf32>
    %31 = vector.shape_cast %30 : vector<16xf32> to vector<16x1xf32>
    %32 = tpu.reciprocal %31 : vector<16x1xf32> -> vector<16x1xf32>
    %33 = vector.broadcast %32 : vector<16x1xf32> to vector<16x16xf32>
    %34 = arith.mulf %29, %33 : vector<16x16xf32>
    %c1 = arith.constant 1 : index
    %c0_15 = arith.constant 0 : index
    %c0_16 = arith.constant 0 : index
    %35 = vector.load %arg3[%c1, %c0_15, %c0_16] : memref<2x8x16xf32, #tpu.memory_space<vmem>>, vector<1x8x16xf32>
    %36 = vector.shape_cast %35 : vector<1x8x16xf32> to vector<8x16xf32>
    %cst_17 = arith.constant dense<0.000000e+00> : vector<8x16xf32>
    %37 = tpu.matmul %36, %34, %cst_17 {dimension_numbers = #tpu.dot_dimension_numbers<[1], [0], [0], [1], [0, 0, 1, 1], [], []>} : vector<8x16xf32>, vector<16x16xf32>, vector<8x16xf32> -> vector<8x16xf32>
    %38 = tpu.concatenate %21, %37 in 0 : vector<8x16xf32>, vector<8x16xf32> -> vector<16x16xf32>
    %c0_18 = arith.constant 0 : index
    %c0_19 = arith.constant 0 : index
    %39 = vector.load %arg4[%c0_18, %c0_19] : memref<16x16xf32, #tpu.memory_space<vmem>>, vector<16x16xf32>
    tpu.vector_store %arg4[%c0_18, %c0_19], %38 {strides = array<i32>} : memref<16x16xf32, #tpu.memory_space<vmem>>, vector<16x16xf32>,
    return
  }
}

</mosaic_0001>

<bundles_post_ra>
// kernel: tpu_custom_call.1
= control target key start
LH: loop header
LB: loop body
LE: loop exit
PB: predicated region body
PF: predicated region fallthrough
CT: control target
= control target key end

     0   :  { %9 = vsyncpa [#allocation3], 0  ;;  %s958_s0 = inlined_call_operand.hbm [shape: f32[16,32], index: 0, kind: input, shape index: {}]   ;;  %s959_s1 = inlined_call_operand.hbm [shape: f32[32,32], index: 1, kind: input, shape index: {}]   ;;  %s960_s2 = inlined_call_operand.vmem [shape: f32[1,32], index: 2, kind: input, shape index: {}]   ;;  %s961_s3 = inlined_call_operand.hbm [shape: f32[2,8,16], index: 3, kind: input, shape index: {}]   ;;  %s962_s4 = inlined_call_operand.hbm [shape: f32[16,16], index: 4, kind: output, shape index: {}]  }
   0x1   :  { %10 = vsyncpa [#allocation6], 0 }
   0x2   :  { %11 = vsyncpa [#allocation4], 0  ;;  %s832_s15 = smov [#allocation5]   ;;  %s833_s17 = smov [#allocation2]  }
   0x3   :  { %s29_s16 = sshll.u32 %s832_s15, 4  ;;  %s17_s18 = sshll.u32 %s833_s17, 4  ;;  %s30_s16 = int_to_ptr.vmem [resolvable:$true] %s29_s16  ;;  %s866_s18 = int_to_ptr.vmem [resolvable:$true] %s17_s18 }
   0x4   :  { %s738_s21 = scalar_lea.hbm %s959_s1, 512 }
   0x5   :  { %p739_p0 = scmp.ne.s32.totalorder %s959_s1, %s738_s21  ;;  %p742_p1 = scmp.lt.u32.totalorder %s738_s21, %s959_s1 }
   0x7   :  { %p744_p2 = pnand %p742_p1, %p739_p0 }
   0x9   :  { %747 = shalt.err (!%p744_p2)
}
   0xa   :  { %s748_s26 = scalar_lea.vmem %s30_s16, 512  ;;  %p753_p4 = scmp.lt.s32.totalorder %s30_s16, %s30_s16 }
   0xb   :  { %p749_p3 = scmp.ne.s32.totalorder %s30_s16, %s748_s26  ;;  %p754_p5 = scmp.lt.s32.totalorder %s748_s26, %s748_s26 }
   0xd   :  { %p755_p6 = por %p754_p5, %p753_p4 }
   0xf   :  { %p756_p7 = pnand %p755_p6, %p749_p3 }
  0x11   :  { %759 = shalt.err (!%p756_p7)
}
  0x12   :  { %s834_s27 = smov 128   ;;  %s835_s28 = smov 8  }
  0x13   :  { %35 = dma.hbm_to_vmem [thread:$0]  %s959_s1, 512, %s30_s16, [#allocation6], %s834_s27, %s834_s27, %s835_s28  }
  0x14   :  { %s760_s7 = scalar_lea.hbm %s958_s0, 256 }
  0x15   :  { %p761_p8 = scmp.ne.s32.totalorder %s958_s0, %s760_s7  ;;  %p764_p9 = scmp.lt.u32.totalorder %s760_s7, %s958_s0 }
  0x17   :  { %p766_p10 = pnand %p764_p9, %p761_p8 }
  0x19   :  { %769 = shalt.err (!%p766_p10)
}
  0x1a   :  { %s770_s12 = scalar_lea.vmem %s866_s18, 256  ;;  %p775_p12 = scmp.lt.s32.totalorder %s866_s18, %s866_s18 }
  0x1b   :  { %p771_p11 = scmp.ne.s32.totalorder %s866_s18, %s770_s12  ;;  %p776_p13 = scmp.lt.s32.totalorder %s770_s12, %s770_s12 }
  0x1d   :  { %p777_p0 = por %p776_p13, %p775_p12 }
  0x1f   :  { %p778_p1 = pnand %p777_p0, %p771_p11 }
  0x21   :  { %781 = shalt.err (!%p778_p1)
}
  0x22   :  { %23 = dma.hbm_to_vmem [thread:$0]  %s958_s0, 256, %s866_s18, [#allocation3], %s834_s27, %s834_s27, %s835_s28  }
  0x23   :  { %s836_s14 = smov [#allocation7]   ;;  %s782_s19 = scalar_lea.hbm %s961_s3, 256 }
  0x24   :  { %s43_s15 = sshll.u32 %s836_s14, 4  ;;  %p783_p2 = scmp.ne.s32.totalorder %s961_s3, %s782_s19  ;;  %s44_s15 = int_to_ptr.vmem [resolvable:$true] %s43_s15 }
  0x25   :  { %p786_p3 = scmp.lt.u32.totalorder %s782_s19, %s961_s3 }
  0x27   :  { %p788_p4 = pnand %p786_p3, %p783_p2 }
  0x29   :  { %791 = shalt.err (!%p788_p4)
}
  0x2a   :  { %s792_s24 = scalar_lea.vmem %s44_s15, 256  ;;  %p797_p6 = scmp.lt.s32.totalorder %s44_s15, %s44_s15 }
  0x2b   :  { %p793_p5 = scmp.ne.s32.totalorder %s44_s15, %s792_s24  ;;  %p798_p7 = scmp.lt.s32.totalorder %s792_s24, %s792_s24 }
  0x2d   :  { %p799_p8 = por %p798_p7, %p797_p6 }
  0x2f   :  { %p800_p9 = pnand %p799_p8, %p793_p5 }
  0x31   :  { %803 = shalt.err (!%p800_p9)
}
  0x32   :  { %49 = dma.hbm_to_vmem [thread:$0]  %s961_s3, 256, %s44_s15, [#allocation6], %s834_s27, %s834_s27, %s835_s28  }
  0x33   :  { %826 = dma.done.wait [#allocation3], 256  }
  0x34   :  { %827 = vsyncadd [#allocation3], 4294967040 }
  0x35   :  { %828 = dma.done.wait [#allocation6], 768  }
  0x36   :  { %829 = vsyncadd [#allocation6], 4294966528  ;;  %vm72_vm0 = vcmask 261120   ;;  %v61_v0 = vld [vmem:[#allocation5] sm:$0xff]  ;;  %v62_v1 = vld [vmem:[#allocation5 + $0x8] sm:$0xff]  ;;  %vm186_vm1 = vcmask 64512  }
  0x37   :  { %v63_v2 = vld [vmem:[#allocation5 + $0x10] sm:$0xff]  ;;  %v699_v3 = vpack.c.bf16 %v62_v1, %v61_v0  ;;  %v64_v4 = vld [vmem:[#allocation5 + $0x18] sm:$0xff]  ;;  %vm282_vm2 = vcmask 130048   ;;  %v837_v53 = vmov 0.0|0.0   ;;  %vm838_vm3 = vmmov 0  }
  0x38   :  { %v59_v5 = vld [vmem:[#allocation2] sm:$0xff]  ;;  %v703_v6 = vpack.c.bf16 %v64_v4, %v63_v2  ;;  %v60_v7 = vld [vmem:[#allocation2 + $0x8] sm:$0xff]  ;;  %v839_v54 = vmov 0.0   ;;  %v305_v2 = vld [vmem:[#allocation7] sm:$0xff] }
  0x39   :  { %666 = vmatprep.mubr.msk.f32.mxu0 %vm72_vm0, %v59_v5  ;;  %700 = vmatprep.subr.bf16.mxu0 %v699_v3  ;;  %v623_v8 = vld [vmem:[%s960_s2] ss:$0 sm:$0xff]  ;;  %s840_s2 = smov [#allocation8]  }
  0x3a   :  { %702 = vmatpush3.bf16.msra.mxu0 %v699_v3  ;;  %s610_s26 = sshll.u32 %s840_s2, 4  ;;  %s611_s26 = int_to_ptr.vmem [resolvable:$true] %s610_s26 }
  0x3b   :  { %704 = vmatprep.subr.bf16.mxu0 %v703_v6  ;;  %s804_s29 = scalar_lea.vmem %s611_s26, 256  ;;  %p809_p11 = scmp.lt.s32.totalorder %s611_s26, %s611_s26 }
  0x3c   :  { %p805_p10 = scmp.ne.s32.totalorder %s611_s26, %s804_s29  ;;  %p810_p12 = scmp.lt.s32.totalorder %s804_s29, %s804_s29 }
  0x3e   :  { %706 = vmatpush3.bf16.msra.mxu0 %v703_v6  ;;  %v529_v6 = vld [vmem:[#allocation7 + $0x8] sm:$0xff]  ;;  %p811_p13 = por %p810_p12, %p809_p11 }
  0x40   :  { %p812_p0 = pnand %p811_p13, %p805_p10 }
  0x41   :  { %667 = vmatmul.mubr.msk.f32.vlgmr.msra.gmra.mrb[0].mxu0 %vm72_vm0, %v60_v7 }
 0x114   :  { %v668_v9 = vpop.f32.mrb[0].mxu0 }
 0x115   :  { %v151_v10 = vadd.f32 %v668_v9, %v623_v8  ;;  %v145_v11 = vpop.f32.mrb[1].mxu0 }
 0x116   :  { %v146_v12 = vadd.f32 %v623_v8, %v145_v11 }
 0x117   :  { %684 = vmatprep.subr.mxu0 %v151_v10 }
 0x118   :  { %685 = vmatpush3.msra.mxu0 %v151_v10  ;;  %154 = vxpose.xlu0.b32.start.end [1/1] (short) (narrow) %v146_v12, 32 }
 0x119   :  { %669 = vmatprep.subr.mxu1 %v146_v12 }
 0x11a   :  { %670 = vmatpush3.msra.mxu1 %v146_v12 }
 0x11b   :  { %707 = vmatprep.subr.bf16.mxu1 %v837_v53 }
 0x125   :  { %379 = vxpose.xlu0.b32.start.end [1/1] (short) (narrow) %v151_v10, 32 }
 0x198   :  { %v170_v13 = vpop.trf.xlu0 }
 0x199   :  { %671 = vmatprep.mubr.msk.f32.mxu1 %vm186_vm1, %v170_v13 }
 0x19c   :  { %v171_v14 = vpop.trf.xlu0 }
 0x19d   :  { %672 = vmatmul.mubr.msk.f32.vlgmr.msra.gmra.mrb[0].mxu1 %vm186_vm1, %v171_v14 }
 0x1a0   :  { %v172_v15 = vpop.trf.xlu0 }
 0x1a1   :  { %674 = vmatprep.mubr.msk.f32.mxu1 %vm186_vm1, %v172_v15 }
 0x1a4   :  { %v173_v16 = vpop.trf.xlu0 }
 0x1a5   :  { %675 = vmatmul.mubr.msk.f32.gmra.mrb[2].mxu1 %vm186_vm1, %v173_v16 }
 0x1a6   :  { %681 = vmatprep.mubr.msk.f32.mxu1 %vm838_vm3, %v839_v54 }
 0x1a8   :  { %v395_v17 = vpop.trf.xlu0 }
 0x1a9   :  { %686 = vmatprep.mubr.msk.f32.mxu0 %vm186_vm1, %v395_v17 }
 0x1ac   :  { %v396_v18 = vpop.trf.xlu0 }
 0x1ad   :  { %687 = vmatmul.mubr.msk.f32.vlgmr.msra.gmra.mrb[2].mxu0 %vm186_vm1, %v396_v18 }
 0x1b0   :  { %v397_v19 = vpop.trf.xlu0 }
 0x1b1   :  { %689 = vmatprep.mubr.msk.f32.mxu0 %vm186_vm1, %v397_v19 }
 0x1b4   :  { %v398_v20 = vpop.trf.xlu0 }
 0x1b5   :  { %690 = vmatmul.mubr.msk.f32.gmra.mrb[4].mxu0 %vm186_vm1, %v398_v20 }
 0x270   :  { %v673_v21 = vpop.f32.mrb[0].mxu1 }
 0x271   :  { %v265_v22 = vpop.f32.mrb[1].mxu1 }
 0x278   :  { %v676_v23 = vpop.f32.mrb[2].mxu1 }
 0x279   :  { %v273_v24 = vpop.f32.mrb[3].mxu1  ;;  %v286_v25 = vsel %vm282_vm2, %v676_v23, -inf }
 0x27a   :  { %287 = vmax.xlane.f32.xlu1 %v286_v25  ;;  %v283_v31 = vsel %vm282_vm2, %v273_v24, -inf }
 0x280   :  { %v688_v26 = vpop.f32.mrb[2].mxu0 }
 0x281   :  { %v489_v27 = vpop.f32.mrb[3].mxu0 }
 0x288   :  { %v691_v28 = vpop.f32.mrb[4].mxu0 }
 0x289   :  { %v497_v29 = vpop.f32.mrb[5].mxu0  ;;  %v509_v32 = vsel %vm282_vm2, %v691_v28, -inf }
 0x28a   :  { %v506_v30 = vsel %vm282_vm2, %v497_v29, -inf }
 0x28b   :  { %507 = vmax.xlane.f32.xlu1 %v506_v30 }
 0x28f   :  { %284 = vmax.xlane.f32.xlu1 %v283_v31 }
 0x293   :  { %510 = vmax.xlane.f32.xlu1 %v509_v32 }
 0x307   :  { %v288_v33 = vpop.xlane.xlu1 %287 }
 0x308   :  { %v290_v34 = vsub.f32 %v676_v23, %v288_v33 }
 0x30a   :  { %v293_v35 = vmul.f32 1.442695, %v290_v34 }
 0x30c   :  { %722 = vpow2.f32 %v293_v35 }
 0x316   :  { %v723_v36 = vpop.eup %722 }
 0x317   :  { %v298_v37 = vsel %vm282_vm2, %v723_v36, 0.0 }
 0x318   :  { %299 = vadd.xlane.f32.xlu0 %v298_v37  ;;  %v508_v38 = vpop.xlane.xlu1 %507 }
 0x319   :  { %v512_v39 = vsub.f32 %v497_v29, %v508_v38 }
 0x31b   :  { %v514_v40 = vmul.f32 1.442695, %v512_v39 }
 0x31c   :  { %v285_v41 = vpop.xlane.xlu1 %284 }
 0x31d   :  { %724 = vpow2.f32 %v514_v40  ;;  %v289_v42 = vsub.f32 %v273_v24, %v285_v41 }
 0x31f   :  { %v291_v43 = vmul.f32 1.442695, %v289_v42 }
 0x320   :  { %v511_v44 = vpop.xlane.xlu1 %510 }
 0x321   :  { %726 = vpow2.f32 %v291_v43  ;;  %v513_v45 = vsub.f32 %v691_v28, %v511_v44 }
 0x323   :  { %v516_v46 = vmul.f32 1.442695, %v513_v45 }
 0x325   :  { %728 = vpow2.f32 %v516_v46 }
 0x327   :  { %v725_v47 = vpop.eup %724 }
 0x328   :  { %v518_v48 = vsel %vm282_vm2, %v725_v47, 0.0 }
 0x329   :  { %519 = vadd.xlane.f32.xlu1 %v518_v48 }
 0x32b   :  { %v727_v49 = vpop.eup %726 }
 0x32c   :  { %v295_v50 = vsel %vm282_vm2, %v727_v49, 0.0 }
 0x32d   :  { %296 = vadd.xlane.f32.xlu1 %v295_v50 }
 0x32f   :  { %v729_v51 = vpop.eup %728 }
 0x330   :  { %v521_v52 = vsel %vm282_vm2, %v729_v51, 0.0 }
 0x331   :  { %522 = vadd.xlane.f32.xlu1 %v521_v52 }
 0x3a5   :  { %v300_v55 = vpop.xlane.xlu0 %299 }
 0x3a6   :  { %730 = vrcp.f32 %v300_v55 }
 0x3b0   :  { %v731_v59 = vpop.eup %730 }
 0x3b1   :  { %v304_v62 = vmul.f32 %v731_v59, %v723_v36 }
 0x3b6   :  { %v520_v56 = vpop.xlane.xlu1 %519 }
 0x3ba   :  { %v297_v57 = vpop.xlane.xlu1 %296 }
 0x3bb   :  { %732 = vrcp.f32 %v297_v57 }
 0x3bc   :  { %734 = vrcp.f32 %v520_v56 }
 0x3be   :  { %v523_v58 = vpop.xlane.xlu1 %522 }
 0x3bf   :  { %736 = vrcp.f32 %v523_v58 }
 0x3c5   :  { %v733_v60 = vpop.eup %732 }
 0x3c6   :  { %v303_v61 = vmul.f32 %v733_v60, %v727_v49  ;;  %v735_v63 = vpop.eup %734 }
 0x3c7   :  { %v526_v3 = vmul.f32 %v735_v63, %v725_v47 }
 0x3c8   :  { %v708_v0 = vpack.c.bf16 %v304_v62, %v303_v61 }
 0x3c9   :  { %v737_v1 = vpop.eup %736 }
 0x3ca   :  { %709 = vmatpush3.bf16.msra.mxu1 %v708_v0  ;;  %v527_v4 = vmul.f32 %v737_v1, %v729_v51 }
 0x3cb   :  { %710 = vmatprep.subr.bf16.mxu1 %v837_v53 }
 0x3cc   :  { %v711_v5 = vpack.c.bf16 %v527_v4, %v526_v3 }
 0x3cd   :  { %682 = vmatmul.mubr.msk.f32.vlgmr.msra.gmra.mrb[4].mxu1 %vm282_vm2, %v305_v2 }
 0x3ce   :  { %712 = vmatpush3.bf16.msra.mxu1 %v711_v5  ;;  %696 = vmatprep.mubr.msk.f32.mxu1 %vm838_vm3, %v839_v54 }
 0x3d1   :  { %697 = vmatmul.mubr.msk.f32.vlgmr.msra.gmra.mrb[6].mxu1 %vm282_vm2, %v529_v6 }
 0x4a0   :  { %v375_v7 = vpop.f32.mrb[4].mxu1 }
 0x4a1   :  { %603 = vst.msk [vmem:[#allocation8] sm:$0xff] %vm282_vm2, %v375_v7  ;;  %v683_v8 = vpop.f32.mrb[5].mxu1 }
 0x4a4   :  { %v599_v9 = vpop.f32.mrb[6].mxu1 }
 0x4a5   :  { %604 = vst.msk [vmem:[#allocation8 + $0x8] sm:$0xff] %vm282_vm2, %v599_v9  ;;  %v698_v10 = vpop.f32.mrb[7].mxu1 }
 0x4a6   :  { %815 = shalt.err (!%p812_p0)
}
 0x4a7   :  { %s816_s6 = scalar_lea.hbm %s962_s4, 256 }
 0x4a8   :  { %p817_p1 = scmp.ne.s32.totalorder %s962_s4, %s816_s6  ;;  %p820_p2 = scmp.lt.u32.totalorder %s816_s6, %s962_s4 }
 0x4aa   :  { %p822_p3 = pnand %p820_p2, %p817_p1 }
 0x4ac   :  { %825 = shalt.err (!%p822_p3)
}
 0x4ad   :  { %616 = dma.vmem_to_hbm [thread:$0]  %s611_s26, 256, %s962_s4, [#allocation4], %s834_s27, %s834_s27, %s835_s28  }
 0x4ae   :  { %830 = dma.done.wait [#allocation4], 256  }
 0x4af   :  { %831 = vsyncadd [#allocation4], 4294967040 }
 0x4b0   :  { %620 = vsyncpa [#allocation3], 1 }
 0x4b1   :  { %621 = vsyncpa [#allocation6], 1 }
 0x4b2   :  { %622 = vsyncpa [#allocation4], 1 }

</bundles_post_ra>
